<compile_context>
chip_gen: v6e
topology: v6e:2x2x1
jax: 0.10.0
libtpu: 0.0.40
codegen_flags: <defaults>
</compile_context>

<pallas_src>
import functools

import jax
import jax.numpy as jnp
from jax.experimental import pallas as pl
from jax.experimental.pallas import tpu as pltpu

EPS = 1e-5


# -----------------------------------------------------------------------------------
# Kernel A: global BN statistics (pass 0) + folded-BN conv / ReLU / psi conv (pass 1).
# -----------------------------------------------------------------------------------
def _stats_psi_kernel(
        g_ref, x_ref,
        wg_ref, wx_ref, gamg_ref, betg_ref, gamx_ref, betx_ref, wpsi_ref,
        psi_ref, pstats_ref,
        sg_sum, sg_sq, sx_sum, sx_sq, p_sum, p_sq,
        *, inv_count):
    p = pl.program_id(0)   # 0 = branch-stats pass, 1 = psi pass
    n = pl.program_id(1)   # batch index
    t = pl.program_id(2)   # spatial tile index

    g = g_ref[...].astype(jnp.float32)        # (F_g, TILE)  spatial on the lane axis
    x = x_ref[...].astype(jnp.float32)        # (F_l, TILE)

    # -------- pass 0: accumulate global BN statistics for both branches -------------
    @pl.when(p == 0)
    def _branch_stats():
        @pl.when(jnp.logical_and(n == 0, t == 0))
        def _init():
            sg_sum[...] = jnp.zeros_like(sg_sum)
            sg_sq[...] = jnp.zeros_like(sg_sq)
            sx_sum[...] = jnp.zeros_like(sx_sum)
            sx_sq[...] = jnp.zeros_like(sx_sq)
            p_sum[...] = jnp.zeros_like(p_sum)
            p_sq[...] = jnp.zeros_like(p_sq)

        # Bias-free 1x1 convs (channel-major matmuls on the MXU); conv bias cancels
        # under training-mode BN and variance is bias-invariant.
        yg = jnp.dot(wg_ref[...], g, preferred_element_type=jnp.float32)  # (F_int, TILE)
        yx = jnp.dot(wx_ref[...], x, preferred_element_type=jnp.float32)
        # Cross-lane reduce rides the XLU slot underneath the MXU-bound conv work.
        sg_sum[...] += jnp.sum(yg, axis=1, keepdims=True)
        sg_sq[...] += jnp.sum(yg * yg, axis=1, keepdims=True)
        sx_sum[...] += jnp.sum(yx, axis=1, keepdims=True)
        sx_sq[...] += jnp.sum(yx * yx, axis=1, keepdims=True)

    # -------- pass 1: folded normalize + ReLU + psi conv, cache psi_pre -------------
    @pl.when(p == 1)
    def _psi_pass():
        # Fold BN into the conv weights:  BN(W@v + b) == (sc*W)@v + (beta - mean_raw*sc)
        # with sc = gamma * rsqrt(var + eps).  sc/shift are (F_int, 1) column vectors.
        mg = sg_sum[...] * inv_count
        vg = sg_sq[...] * inv_count - mg * mg
        scg = gamg_ref[...] * jax.lax.rsqrt(vg + EPS)
        mx = sx_sum[...] * inv_count
        vx = sx_sq[...] * inv_count - mx * mx
        scx = gamx_ref[...] * jax.lax.rsqrt(vx + EPS)
        shift = (betg_ref[...] - mg * scg) + (betx_ref[...] - mx * scx)

        act = jnp.maximum(
            jnp.dot(scg * wg_ref[...], g, preferred_element_type=jnp.float32)
            + jnp.dot(scx * wx_ref[...], x, preferred_element_type=jnp.float32)
            + shift,
            0.0)                                                      # (F_int, TILE)

        # psi 1x1 conv on the (otherwise idle) MXU instead of a VALU/XLU sublane reduce.
        psi_raw = jnp.dot(wpsi_ref[...], act,
                          preferred_element_type=jnp.float32)         # (1, TILE)

        p_sum[...] += jnp.sum(psi_raw, axis=1, keepdims=True)
        p_sq[...] += jnp.sum(psi_raw * psi_raw, axis=1, keepdims=True)
        psi_ref[...] = psi_raw.astype(psi_ref.dtype)                  # lane-dense store

        @pl.when(jnp.logical_and(n == pl.num_programs(1) - 1,
                                 t == pl.num_programs(2) - 1))
        def _emit_psi_stats():
            pstats_ref[0:1, :] = p_sum[...]
            pstats_ref[1:2, :] = p_sq[...]


# -----------------------------------------------------------------------------------
# Kernel B: fully parallel finalize / gating pass (no matmul, no g, no recompute).
# -----------------------------------------------------------------------------------
def _gate_kernel(x_ref, psi_ref, aff_ref, out_ref):
    aff = aff_ref[...]                                       # (1, 2) = [psi_scale, psi_shift]
    attn = jax.nn.sigmoid(psi_ref[...] * aff[:, 0:1] + aff[:, 1:2])   # (1, TILE)
    out_ref[...] = (x_ref[...].astype(jnp.float32) * attn).astype(out_ref.dtype)


# -----------------------------------------------------------------------------------
# VMEM-aware sizing helpers.
# -----------------------------------------------------------------------------------
def _vmem_budget_bytes():
    """~3/4 of physical VMEM (96 MiB on v5e/v6e, 48 MiB on v7x); 32 MiB fallback."""
    try:
        cap = getattr(pltpu.get_tpu_info(), "vmem_capacity_bytes", None)
        if cap:
            return int(min(96 * 1024 * 1024, max(32 * 1024 * 1024, cap * 3 // 4)))
    except Exception:
        pass
    return 32 * 1024 * 1024


def _pick_tile_hw(hw, f_g, f_l, f_int, vmem_limit):
    """Largest multiple of 128 dividing hw whose kernel-A working set (double-buffered
    g/x tiles + psi tile + f32 intermediates + resident weights) fits ~60% of VMEM."""
    if hw % 128 != 0:
        # TODO(synk): pad H*W up to a multiple of 128 in the wrapper for lane-dense stores.
        return hw
    per_lane_bytes = 4 * (2 * (f_g + f_l) + 2 + 3 * f_int + 8)
    const_bytes = 4 * 2 * (f_int * (f_g + f_l) + 8 * f_int + 16)
    budget = int(vmem_limit * 0.6) - const_bytes
    t_cap = max(128, (budget // per_lane_bytes) // 128 * 128) if budget > 0 else 128
    t = min(hw, 8192, t_cap)
    t -= t % 128
    while t >= 128 and hw % t != 0:
        t -= 128
    return t if t >= 128 else hw


# -----------------------------------------------------------------------------------
# Wrapper.
# -----------------------------------------------------------------------------------
def attention_block(g, x, params, *, tile_hw=None, vmem_limit_bytes=None):
    """g: (N, F_g, H, W), x: (N, F_l, H, W) NCHW float32.  Returns (N, F_l, H, W)."""
    N, F_g, H, W = g.shape
    _, F_l, _, _ = x.shape
    F_int = params["wg"].shape[0]
    HW = H * W

    vmem_limit = vmem_limit_bytes if vmem_limit_bytes is not None else _vmem_budget_bytes()
    if tile_hw is None:
        tile_hw = _pick_tile_hw(HW, F_g, F_l, F_int, vmem_limit)
    assert HW % tile_hw == 0, "spatial tile must divide H*W"
    n_tiles = HW // tile_hw

    # NCHW is already channel-major: pure reshapes, zero data movement.
    g3 = g.reshape(N, F_g, HW)
    x3 = x.reshape(N, F_l, HW)

    col = lambda v: v.reshape(-1, 1)
    wg, wx = params["wg"], params["wx"]                       # (F_int, C_in) conv weights
    gamg, betg = col(params["gamma_g"]), col(params["beta_g"])
    gamx, betx = col(params["gamma_x"]), col(params["beta_x"])
    wpsi_row = params["wpsi"].reshape(1, F_int)

    inv_count = 1.0 / float(N * HW)
    kernel_a = functools.partial(_stats_psi_kernel, inv_count=inv_count)

    def io_map(p, n, t):
        return (n, 0, t)

    def const_map(p, n, t):
        return (0, 0)

    def psi_out_map(p, n, t):
        # Pinned to block (0,0,0) during the stats pass; the first real write (p=1,n=0,t=0)
        # lands on the same block, so nothing uninitialized is ever flushed to HBM.
        sel = (p == 1).astype(jnp.int32)
        return (n * sel, 0, t * sel)

    psi3, pstats = pl.pallas_call(
        kernel_a,
        grid=(2, N, n_tiles),
        in_specs=[
            pl.BlockSpec((None, F_g, tile_hw), io_map),
            pl.BlockSpec((None, F_l, tile_hw), io_map),
            pl.BlockSpec((F_int, F_g), const_map),
            pl.BlockSpec((F_int, F_l), const_map),
            pl.BlockSpec((F_int, 1), const_map),
            pl.BlockSpec((F_int, 1), const_map),
            pl.BlockSpec((F_int, 1), const_map),
            pl.BlockSpec((F_int, 1), const_map),
            pl.BlockSpec((1, F_int), const_map),
        ],
        out_specs=(
            pl.BlockSpec((None, 1, tile_hw), psi_out_map),
            pl.BlockSpec((2, 1), lambda p, n, t: (0, 0)),   # written once, flushed at grid end
        ),
        out_shape=(
            jax.ShapeDtypeStruct((N, 1, HW), jnp.float32),   # cached psi_pre (1 channel)
            jax.ShapeDtypeStruct((2, 1), jnp.float32),       # [psi sum, psi sum-of-squares]
        ),
        scratch_shapes=[
            pltpu.VMEM((F_int, 1), jnp.float32),   # gate-branch sum
            pltpu.VMEM((F_int, 1), jnp.float32),   # gate-branch sum of squares
            pltpu.VMEM((F_int, 1), jnp.float32),   # x-branch sum
            pltpu.VMEM((F_int, 1), jnp.float32),   # x-branch sum of squares
            pltpu.VMEM((1, 1), jnp.float32),       # psi sum
            pltpu.VMEM((1, 1), jnp.float32),       # psi sum of squares
        ],
        compiler_params=pltpu.CompilerParams(
            # BN stat accumulators carry state across every axis -> all "arbitrary".
            # TODO(synk): a v7x 2-TC split of this pass needs per-core partial stats
            # combined via CMEM/VMEM_SHARED + core_barrier; the finalize kernel below
            # is already fully parallel.
            dimension_semantics=("arbitrary", "arbitrary", "arbitrary"),
            vmem_limit_bytes=vmem_limit,
        ),
    )(g3, x3, wg, wx, gamg, betg, gamx, betx, wpsi_row)

    # Tiny scalar epilogue: collapse psi's global stats into one affine.
    # (bpsi cancels under training-mode BN, exactly like the branch conv biases.)
    pm = pstats[0, 0] * inv_count
    pv = pstats[1, 0] * inv_count - pm * pm
    ps = params["gamma_p"][0] * jax.lax.rsqrt(pv + EPS)
    pb = params["beta_p"][0] - pm * ps
    psi_aff = jnp.stack([ps, pb]).reshape(1, 2).astype(jnp.float32)

    out3 = pl.pallas_call(
        _gate_kernel,
        grid=(N, n_tiles),
        in_specs=[
            pl.BlockSpec((None, F_l, tile_hw), lambda n, t: (n, 0, t)),
            pl.BlockSpec((None, 1, tile_hw), lambda n, t: (n, 0, t)),
            pl.BlockSpec((1, 2), lambda n, t: (0, 0)),
        ],
        out_specs=pl.BlockSpec((None, F_l, tile_hw), lambda n, t: (n, 0, t)),
        out_shape=jax.ShapeDtypeStruct((N, F_l, HW), x.dtype),
        compiler_params=pltpu.CompilerParams(
            dimension_semantics=("parallel", "parallel"),
            vmem_limit_bytes=vmem_limit,
        ),
    )(x3, psi3, psi_aff)

    return out3.reshape(N, F_l, H, W)   # pure reshape back to NCHW


# -----------------------------------------------------------------------------------
# Pure-JAX reference reproducing the PyTorch forward (training-mode BN, with biases).
# -----------------------------------------------------------------------------------
def _reference(g, x, params):
    def bn(y, gamma, beta):
        mean = jnp.mean(y, axis=(0, 2, 3), keepdims=True)
        var = jnp.mean((y - mean) ** 2, axis=(0, 2, 3), keepdims=True)
        return (y - mean) / jnp.sqrt(var + EPS) * gamma.reshape(1, -1, 1, 1) \
               + beta.reshape(1, -1, 1, 1)

    gated = jnp.einsum('nchw,dc->ndhw', g, params["wg"]) + params["bg"].reshape(1, -1, 1, 1)
    gated = bn(gated, params["gamma_g"], params["beta_g"])
    layer = jnp.einsum('nchw,dc->ndhw', x, params["wx"]) + params["bx"].reshape(1, -1, 1, 1)
    layer = bn(layer, params["gamma_x"], params["beta_x"])
    act = jnp.maximum(gated + layer, 0.0)
    psi = jnp.einsum('ndhw,d->nhw', act, params["wpsi"][0])[:, None] \
          + params["bpsi"].reshape(1, 1, 1, 1)
    psi = bn(psi, params["gamma_p"], params["beta_p"])
    return x * jax.nn.sigmoid(psi)


def make_params(key, F_g, F_l, F_int):
    ks = jax.random.split(key, 8)
    return {
        # 1x1 conv weights in PyTorch (C_out, C_in) layout
        "wg": 0.2 * jax.random.normal(ks[0], (F_int, F_g), jnp.float32),
        "bg": 0.1 * jax.random.normal(ks[1], (F_int,), jnp.float32),
        "gamma_g": 1.0 + 0.1 * jax.random.normal(ks[2], (F_int,), jnp.float32),
        "beta_g": 0.05 * jax.random.normal(ks[3], (F_int,), jnp.float32),
        "wx": 0.2 * jax.random.normal(ks[4], (F_int, F_l), jnp.float32),
        "bx": 0.1 * jax.random.normal(ks[5], (F_int,), jnp.float32),
        "gamma_x": 1.0 + 0.1 * jax.random.normal(ks[6], (F_int,), jnp.float32),
        "beta_x": 0.05 * jax.random.normal(ks[7], (F_int,), jnp.float32),
        "wpsi": 0.3 * jax.random.normal(jax.random.fold_in(key, 100), (1, F_int), jnp.float32),
        "bpsi": jnp.full((1,), 0.02, jnp.float32),
        "gamma_p": jnp.full((1,), 1.1, jnp.float32),
        "beta_p": jnp.full((1,), -0.05, jnp.float32),
    }


if __name__ == "__main__":
    key = jax.random.PRNGKey(0)
    k_g, k_x, k_p = jax.random.split(key, 3)

    N, F_g, F_l, F_int, H, W = 2, 4, 4, 8, 16, 16
    g = jax.random.normal(k_g, (N, F_g, H, W), jnp.float32)
    x = jax.random.normal(k_x, (N, F_l, H, W), jnp.float32)
    params = make_params(k_p, F_g, F_l, F_int)

    # tile_hw=128 -> 2 spatial tiles x 2 batches x 2 passes in kernel A: exercises the
    # multi-tile global-statistics accumulation and the multi-tile psi cache + gating.
    out = attention_block(g, x, params, tile_hw=128)
    out = jax.block_until_ready(out)

    ref = _reference(g, x, params)
    assert out.shape == (N, F_l, H, W)
    err = jnp.max(jnp.abs(out - ref))
    assert jnp.allclose(out, ref, atol=2e-4, rtol=2e-4), f"max abs err {err}"

    print("KERNEL_OK")
</pallas_src>

<mosaic_0001>
module attributes {stable_mosaic.version = 11 : i64} {
  func.func @_stats_psi_kernel(%arg0: i32, %arg1: i32, %arg2: i32, %arg3: memref<1x4x128xf32, #tpu.memory_space<vmem>>, %arg4: memref<1x4x128xf32, #tpu.memory_space<vmem>>, %arg5: memref<8x4xf32, #tpu.memory_space<vmem>>, %arg6: memref<8x4xf32, #tpu.memory_space<vmem>>, %arg7: memref<8x1xf32, #tpu.memory_space<vmem>>, %arg8: memref<8x1xf32, #tpu.memory_space<vmem>>, %arg9: memref<8x1xf32, #tpu.memory_space<vmem>>, %arg10: memref<8x1xf32, #tpu.memory_space<vmem>>, %arg11: memref<1x8xf32, #tpu.memory_space<vmem>>, %arg12: memref<1x1x128xf32, #tpu.memory_space<vmem>>, %arg13: memref<2x1xf32, #tpu.memory_space<vmem>>, %arg14: memref<8x1xf32, #tpu.memory_space<vmem>>, %arg15: memref<8x1xf32, #tpu.memory_space<vmem>>, %arg16: memref<8x1xf32, #tpu.memory_space<vmem>>, %arg17: memref<8x1xf32, #tpu.memory_space<vmem>>, %arg18: memref<1x1xf32, #tpu.memory_space<vmem>>, %arg19: memref<1x1xf32, #tpu.memory_space<vmem>>) attributes {dimension_semantics = [#tpu.dimension_semantics<arbitrary>, #tpu.dimension_semantics<arbitrary>, #tpu.dimension_semantics<arbitrary>], iteration_bounds = array<i64: 2, 2, 2>, scalar_prefetch = 0 : i64, scratch_operands = 6 : i64, tpu.core_type = #tpu.core_type<tc>, window_params = [{transform_indices = @transform_0, window_bounds = array<i64: 1, 4, 128>}, {transform_indices = @transform_1, window_bounds = array<i64: 1, 4, 128>}, {pipeline_mode = #tpu.pipeline_mode<synchronous>, transform_indices = @transform_2, window_bounds = array<i64: 8, 4>}, {pipeline_mode = #tpu.pipeline_mode<synchronous>, transform_indices = @transform_3, window_bounds = array<i64: 8, 4>}, {pipeline_mode = #tpu.pipeline_mode<synchronous>, transform_indices = @transform_4, window_bounds = array<i64: 8, 1>}, {pipeline_mode = #tpu.pipeline_mode<synchronous>, transform_indices = @transform_5, window_bounds = array<i64: 8, 1>}, {pipeline_mode = #tpu.pipeline_mode<synchronous>, transform_indices = @transform_6, window_bounds = array<i64: 8, 1>}, {pipeline_mode = #tpu.pipeline_mode<synchronous>, transform_indices = @transform_7, window_bounds = array<i64: 8, 1>}, {pipeline_mode = #tpu.pipeline_mode<synchronous>, transform_indices = @transform_8, window_bounds = array<i64: 1, 8>}, {transform_indices = @transform_9, window_bounds = array<i64: 1, 1, 128>}, {pipeline_mode = #tpu.pipeline_mode<synchronous>, transform_indices = @transform_10, window_bounds = array<i64: 2, 1>}]} {
    %c0 = arith.constant 0 : index
    %c0_0 = arith.constant 0 : index
    %c0_1 = arith.constant 0 : index
    %0 = vector.load %arg3[%c0, %c0_0, %c0_1] : memref<1x4x128xf32, #tpu.memory_space<vmem>>, vector<1x4x128xf32>
    %1 = vector.shape_cast %0 : vector<1x4x128xf32> to vector<4x128xf32>
    %c0_2 = arith.constant 0 : index
    %c0_3 = arith.constant 0 : index
    %c0_4 = arith.constant 0 : index
    %2 = vector.load %arg4[%c0_2, %c0_3, %c0_4] : memref<1x4x128xf32, #tpu.memory_space<vmem>>, vector<1x4x128xf32>
    %3 = vector.shape_cast %2 : vector<1x4x128xf32> to vector<4x128xf32>
    %c0_i32 = arith.constant 0 : i32
    %4 = arith.cmpi eq, %arg0, %c0_i32 : i32
    %5 = arith.extui %4 : i1 to i32
    %c0_i32_5 = arith.constant 0 : i32
    %6 = arith.cmpi ne, %5, %c0_i32_5 : i32
    scf.if %6 {
      %c0_i32_7 = arith.constant 0 : i32
      %10 = arith.cmpi eq, %arg1, %c0_i32_7 : i32
      %c0_i32_8 = arith.constant 0 : i32
      %11 = arith.cmpi eq, %arg2, %c0_i32_8 : i32
      %12 = arith.andi %10, %11 : i1
      %13 = arith.extui %12 : i1 to i32
      %c0_i32_9 = arith.constant 0 : i32
      %14 = arith.cmpi ne, %13, %c0_i32_9 : i32
      scf.if %14 {
        %cst_35 = arith.constant 0.000000e+00 : f32
        %41 = vector.broadcast %cst_35 : f32 to vector<8x1xf32>
        %c0_36 = arith.constant 0 : index
        %c0_37 = arith.constant 0 : index
        %42 = vector.load %arg14[%c0_36, %c0_37] : memref<8x1xf32, #tpu.memory_space<vmem>>, vector<8x1xf32>
        tpu.vector_store %arg14[%c0_36, %c0_37], %41 {strides = array<i32>} : memref<8x1xf32, #tpu.memory_space<vmem>>, vector<8x1xf32>,
        %cst_38 = arith.constant 0.000000e+00 : f32
        %43 = vector.broadcast %cst_38 : f32 to vector<8x1xf32>
        %c0_39 = arith.constant 0 : index
        %c0_40 = arith.constant 0 : index
        %44 = vector.load %arg15[%c0_39, %c0_40] : memref<8x1xf32, #tpu.memory_space<vmem>>, vector<8x1xf32>
        tpu.vector_store %arg15[%c0_39, %c0_40], %43 {strides = array<i32>} : memref<8x1xf32, #tpu.memory_space<vmem>>, vector<8x1xf32>,
        %cst_41 = arith.constant 0.000000e+00 : f32
        %45 = vector.broadcast %cst_41 : f32 to vector<8x1xf32>
        %c0_42 = arith.constant 0 : index
        %c0_43 = arith.constant 0 : index
        %46 = vector.load %arg16[%c0_42, %c0_43] : memref<8x1xf32, #tpu.memory_space<vmem>>, vector<8x1xf32>
        tpu.vector_store %arg16[%c0_42, %c0_43], %45 {strides = array<i32>} : memref<8x1xf32, #tpu.memory_space<vmem>>, vector<8x1xf32>,
        %cst_44 = arith.constant 0.000000e+00 : f32
        %47 = vector.broadcast %cst_44 : f32 to vector<8x1xf32>
        %c0_45 = arith.constant 0 : index
        %c0_46 = arith.constant 0 : index
        %48 = vector.load %arg17[%c0_45, %c0_46] : memref<8x1xf32, #tpu.memory_space<vmem>>, vector<8x1xf32>
        tpu.vector_store %arg17[%c0_45, %c0_46], %47 {strides = array<i32>} : memref<8x1xf32, #tpu.memory_space<vmem>>, vector<8x1xf32>,
        %cst_47 = arith.constant 0.000000e+00 : f32
        %49 = vector.broadcast %cst_47 : f32 to vector<1x1xf32>
        %c0_48 = arith.constant 0 : index
        %c0_49 = arith.constant 0 : index
        %50 = vector.load %arg18[%c0_48, %c0_49] : memref<1x1xf32, #tpu.memory_space<vmem>>, vector<1x1xf32>
        tpu.vector_store %arg18[%c0_48, %c0_49], %49 {strides = array<i32>} : memref<1x1xf32, #tpu.memory_space<vmem>>, vector<1x1xf32>,
        %cst_50 = arith.constant 0.000000e+00 : f32
        %51 = vector.broadcast %cst_50 : f32 to vector<1x1xf32>
        %c0_51 = arith.constant 0 : index
        %c0_52 = arith.constant 0 : index
        %52 = vector.load %arg19[%c0_51, %c0_52] : memref<1x1xf32, #tpu.memory_space<vmem>>, vector<1x1xf32>
        tpu.vector_store %arg19[%c0_51, %c0_52], %51 {strides = array<i32>} : memref<1x1xf32, #tpu.memory_space<vmem>>, vector<1x1xf32>,
      } else {
      }
      %c0_10 = arith.constant 0 : index
      %c0_11 = arith.constant 0 : index
      %15 = vector.load %arg5[%c0_10, %c0_11] : memref<8x4xf32, #tpu.memory_space<vmem>>, vector<8x4xf32>
      %cst = arith.constant dense<0.000000e+00> : vector<8x128xf32>
      %16 = tpu.matmul %15, %1, %cst {dimension_numbers = #tpu.dot_dimension_numbers<[1], [0], [0], [1], [0, 0, 1, 1], [], []>} : vector<8x4xf32>, vector<4x128xf32>, vector<8x128xf32> -> vector<8x128xf32>
      %c0_12 = arith.constant 0 : index
      %c0_13 = arith.constant 0 : index
      %17 = vector.load %arg6[%c0_12, %c0_13] : memref<8x4xf32, #tpu.memory_space<vmem>>, vector<8x4xf32>
      %cst_14 = arith.constant dense<0.000000e+00> : vector<8x128xf32>
      %18 = tpu.matmul %17, %3, %cst_14 {dimension_numbers = #tpu.dot_dimension_numbers<[1], [0], [0], [1], [0, 0, 1, 1], [], []>} : vector<8x4xf32>, vector<4x128xf32>, vector<8x128xf32> -> vector<8x128xf32>
      %c0_15 = arith.constant 0 : index
      %c0_16 = arith.constant 0 : index
      %19 = vector.load %arg14[%c0_15, %c0_16] : memref<8x1xf32, #tpu.memory_space<vmem>>, vector<8x1xf32>
      %cst_17 = arith.constant dense<0.000000e+00> : vector<8xf32>
      %20 = vector.multi_reduction <add>, %16, %cst_17 [1] : vector<8x128xf32> to vector<8xf32>
      %21 = vector.shape_cast %20 : vector<8xf32> to vector<8x1xf32>
      %22 = arith.addf %19, %21 : vector<8x1xf32>
      %c0_18 = arith.constant 0 : index
      %c0_19 = arith.constant 0 : index
      %23 = vector.load %arg14[%c0_18, %c0_19] : memref<8x1xf32, #tpu.memory_space<vmem>>, vector<8x1xf32>
      tpu.vector_store %arg14[%c0_18, %c0_19], %22 {strides = array<i32>} : memref<8x1xf32, #tpu.memory_space<vmem>>, vector<8x1xf32>,
      %c0_20 = arith.constant 0 : index
      %c0_21 = arith.constant 0 : index
      %24 = vector.load %arg15[%c0_20, %c0_21] : memref<8x1xf32, #tpu.memory_space<vmem>>, vector<8x1xf32>
      %25 = arith.mulf %16, %16 : vector<8x128xf32>
      %cst_22 = arith.constant dense<0.000000e+00> : vector<8xf32>
      %26 = vector.multi_reduction <add>, %25, %cst_22 [1] : vector<8x128xf32> to vector<8xf32>
      %27 = vector.shape_cast %26 : vector<8xf32> to vector<8x1xf32>
      %28 = arith.addf %24, %27 : vector<8x1xf32>
      %c0_23 = arith.constant 0 : index
      %c0_24 = arith.constant 0 : index
      %29 = vector.load %arg15[%c0_23, %c0_24] : memref<8x1xf32, #tpu.memory_space<vmem>>, vector<8x1xf32>
      tpu.vector_store %arg15[%c0_23, %c0_24], %28 {strides = array<i32>} : memref<8x1xf32, #tpu.memory_space<vmem>>, vector<8x1xf32>,
      %c0_25 = arith.constant 0 : index
      %c0_26 = arith.constant 0 : index
      %30 = vector.load %arg16[%c0_25, %c0_26] : memref<8x1xf32, #tpu.memory_space<vmem>>, vector<8x1xf32>
      %cst_27 = arith.constant dense<0.000000e+00> : vector<8xf32>
      %31 = vector.multi_reduction <add>, %18, %cst_27 [1] : vector<8x128xf32> to vector<8xf32>
      %32 = vector.shape_cast %31 : vector<8xf32> to vector<8x1xf32>
      %33 = arith.addf %30, %32 : vector<8x1xf32>
      %c0_28 = arith.constant 0 : index
      %c0_29 = arith.constant 0 : index
      %34 = vector.load %arg16[%c0_28, %c0_29] : memref<8x1xf32, #tpu.memory_space<vmem>>, vector<8x1xf32>
      tpu.vector_store %arg16[%c0_28, %c0_29], %33 {strides = array<i32>} : memref<8x1xf32, #tpu.memory_space<vmem>>, vector<8x1xf32>,
      %c0_30 = arith.constant 0 : index
      %c0_31 = arith.constant 0 : index
      %35 = vector.load %arg17[%c0_30, %c0_31] : memref<8x1xf32, #tpu.memory_space<vmem>>, vector<8x1xf32>
      %36 = arith.mulf %18, %18 : vector<8x128xf32>
      %cst_32 = arith.constant dense<0.000000e+00> : vector<8xf32>
      %37 = vector.multi_reduction <add>, %36, %cst_32 [1] : vector<8x128xf32> to vector<8xf32>
      %38 = vector.shape_cast %37 : vector<8xf32> to vector<8x1xf32>
      %39 = arith.addf %35, %38 : vector<8x1xf32>
      %c0_33 = arith.constant 0 : index
      %c0_34 = arith.constant 0 : index
      %40 = vector.load %arg17[%c0_33, %c0_34] : memref<8x1xf32, #tpu.memory_space<vmem>>, vector<8x1xf32>
      tpu.vector_store %arg17[%c0_33, %c0_34], %39 {strides = array<i32>} : memref<8x1xf32, #tpu.memory_space<vmem>>, vector<8x1xf32>,
    } else {
    }
    %c1_i32 = arith.constant 1 : i32
    %7 = arith.cmpi eq, %arg0, %c1_i32 : i32
    %8 = arith.extui %7 : i1 to i32
    %c0_i32_6 = arith.constant 0 : i32
    %9 = arith.cmpi ne, %8, %c0_i32_6 : i32
    scf.if %9 {
      %c0_7 = arith.constant 0 : index
      %c0_8 = arith.constant 0 : index
      %10 = vector.load %arg14[%c0_7, %c0_8] : memref<8x1xf32, #tpu.memory_space<vmem>>, vector<8x1xf32>
      %cst = arith.constant 0.001953125 : f32
      %11 = vector.broadcast %cst : f32 to vector<8x1xf32>
      %12 = arith.mulf %10, %11 : vector<8x1xf32>
      %c0_9 = arith.constant 0 : index
      %c0_10 = arith.constant 0 : index
      %13 = vector.load %arg15[%c0_9, %c0_10] : memref<8x1xf32, #tpu.memory_space<vmem>>, vector<8x1xf32>
      %cst_11 = arith.constant 0.001953125 : f32
      %14 = vector.broadcast %cst_11 : f32 to vector<8x1xf32>
      %15 = arith.mulf %13, %14 : vector<8x1xf32>
      %16 = arith.mulf %12, %12 : vector<8x1xf32>
      %17 = arith.subf %15, %16 : vector<8x1xf32>
      %c0_12 = arith.constant 0 : index
      %c0_13 = arith.constant 0 : index
      %18 = vector.load %arg7[%c0_12, %c0_13] : memref<8x1xf32, #tpu.memory_space<vmem>>, vector<8x1xf32>
      %cst_14 = arith.constant 9.99999974E-6 : f32
      %19 = vector.broadcast %cst_14 : f32 to vector<8x1xf32>
      %20 = arith.addf %17, %19 : vector<8x1xf32>
      %21 = math.rsqrt %20 : vector<8x1xf32>
      %22 = arith.mulf %18, %21 : vector<8x1xf32>
      %c0_15 = arith.constant 0 : index
      %c0_16 = arith.constant 0 : index
      %23 = vector.load %arg16[%c0_15, %c0_16] : memref<8x1xf32, #tpu.memory_space<vmem>>, vector<8x1xf32>
      %cst_17 = arith.constant 0.001953125 : f32
      %24 = vector.broadcast %cst_17 : f32 to vector<8x1xf32>
      %25 = arith.mulf %23, %24 : vector<8x1xf32>
      %c0_18 = arith.constant 0 : index
      %c0_19 = arith.constant 0 : index
      %26 = vector.load %arg17[%c0_18, %c0_19] : memref<8x1xf32, #tpu.memory_space<vmem>>, vector<8x1xf32>
      %cst_20 = arith.constant 0.001953125 : f32
      %27 = vector.broadcast %cst_20 : f32 to vector<8x1xf32>
      %28 = arith.mulf %26, %27 : vector<8x1xf32>
      %29 = arith.mulf %25, %25 : vector<8x1xf32>
      %30 = arith.subf %28, %29 : vector<8x1xf32>
      %c0_21 = arith.constant 0 : index
      %c0_22 = arith.constant 0 : index
      %31 = vector.load %arg9[%c0_21, %c0_22] : memref<8x1xf32, #tpu.memory_space<vmem>>, vector<8x1xf32>
      %cst_23 = arith.constant 9.99999974E-6 : f32
      %32 = vector.broadcast %cst_23 : f32 to vector<8x1xf32>
      %33 = arith.addf %30, %32 : vector<8x1xf32>
      %34 = math.rsqrt %33 : vector<8x1xf32>
      %35 = arith.mulf %31, %34 : vector<8x1xf32>
      %c0_24 = arith.constant 0 : index
      %c0_25 = arith.constant 0 : index
      %36 = vector.load %arg8[%c0_24, %c0_25] : memref<8x1xf32, #tpu.memory_space<vmem>>, vector<8x1xf32>
      %37 = arith.mulf %12, %22 : vector<8x1xf32>
      %38 = arith.subf %36, %37 : vector<8x1xf32>
      %c0_26 = arith.constant 0 : index
      %c0_27 = arith.constant 0 : index
      %39 = vector.load %arg10[%c0_26, %c0_27] : memref<8x1xf32, #tpu.memory_space<vmem>>, vector<8x1xf32>
      %40 = arith.mulf %25, %35 : vector<8x1xf32>
      %41 = arith.subf %39, %40 : vector<8x1xf32>
      %42 = arith.addf %38, %41 : vector<8x1xf32>
      %c0_28 = arith.constant 0 : index
      %c0_29 = arith.constant 0 : index
      %43 = vector.load %arg5[%c0_28, %c0_29] : memref<8x4xf32, #tpu.memory_space<vmem>>, vector<8x4xf32>
      %44 = vector.broadcast %22 : vector<8x1xf32> to vector<8x4xf32>
      %45 = arith.mulf %44, %43 : vector<8x4xf32>
      %cst_30 = arith.constant dense<0.000000e+00> : vector<8x128xf32>
      %46 = tpu.matmul %45, %1, %cst_30 {dimension_numbers = #tpu.dot_dimension_numbers<[1], [0], [0], [1], [0, 0, 1, 1], [], []>} : vector<8x4xf32>, vector<4x128xf32>, vector<8x128xf32> -> vector<8x128xf32>
      %c0_31 = arith.constant 0 : index
      %c0_32 = arith.constant 0 : index
      %47 = vector.load %arg6[%c0_31, %c0_32] : memref<8x4xf32, #tpu.memory_space<vmem>>, vector<8x4xf32>
      %48 = vector.broadcast %35 : vector<8x1xf32> to vector<8x4xf32>
      %49 = arith.mulf %48, %47 : vector<8x4xf32>
      %cst_33 = arith.constant dense<0.000000e+00> : vector<8x128xf32>
      %50 = tpu.matmul %49, %3, %cst_33 {dimension_numbers = #tpu.dot_dimension_numbers<[1], [0], [0], [1], [0, 0, 1, 1], [], []>} : vector<8x4xf32>, vector<4x128xf32>, vector<8x128xf32> -> vector<8x128xf32>
      %51 = arith.addf %46, %50 : vector<8x128xf32>
      %52 = vector.broadcast %42 : vector<8x1xf32> to vector<8x128xf32>
      %53 = arith.addf %51, %52 : vector<8x128xf32>
      %cst_34 = arith.constant 0.000000e+00 : f32
      %54 = vector.broadcast %cst_34 : f32 to vector<8x128xf32>
      %55 = arith.maximumf %53, %54 : vector<8x128xf32>
      %c0_35 = arith.constant 0 : index
      %c0_36 = arith.constant 0 : index
      %56 = vector.load %arg11[%c0_35, %c0_36] : memref<1x8xf32, #tpu.memory_space<vmem>>, vector<1x8xf32>
      %cst_37 = arith.constant dense<0.000000e+00> : vector<1x128xf32>
      %57 = tpu.matmul %56, %55, %cst_37 {dimension_numbers = #tpu.dot_dimension_numbers<[1], [0], [0], [1], [0, 0, 1, 1], [], []>} : vector<1x8xf32>, vector<8x128xf32>, vector<1x128xf32> -> vector<1x128xf32>
      %c0_38 = arith.constant 0 : index
      %c0_39 = arith.constant 0 : index
      %58 = vector.load %arg18[%c0_38, %c0_39] : memref<1x1xf32, #tpu.memory_space<vmem>>, vector<1x1xf32>
      %cst_40 = arith.constant dense<0.000000e+00> : vector<1xf32>
      %59 = vector.multi_reduction <add>, %57, %cst_40 [1] : vector<1x128xf32> to vector<1xf32>
      %60 = vector.shape_cast %59 : vector<1xf32> to vector<1x1xf32>
      %61 = arith.addf %58, %60 : vector<1x1xf32>
      %c0_41 = arith.constant 0 : index
      %c0_42 = arith.constant 0 : index
      %62 = vector.load %arg18[%c0_41, %c0_42] : memref<1x1xf32, #tpu.memory_space<vmem>>, vector<1x1xf32>
      tpu.vector_store %arg18[%c0_41, %c0_42], %61 {strides = array<i32>} : memref<1x1xf32, #tpu.memory_space<vmem>>, vector<1x1xf32>,
      %c0_43 = arith.constant 0 : index
      %c0_44 = arith.constant 0 : index
      %63 = vector.load %arg19[%c0_43, %c0_44] : memref<1x1xf32, #tpu.memory_space<vmem>>, vector<1x1xf32>
      %64 = arith.mulf %57, %57 : vector<1x128xf32>
      %cst_45 = arith.constant dense<0.000000e+00> : vector<1xf32>
      %65 = vector.multi_reduction <add>, %64, %cst_45 [1] : vector<1x128xf32> to vector<1xf32>
      %66 = vector.shape_cast %65 : vector<1xf32> to vector<1x1xf32>
      %67 = arith.addf %63, %66 : vector<1x1xf32>
      %c0_46 = arith.constant 0 : index
      %c0_47 = arith.constant 0 : index
      %68 = vector.load %arg19[%c0_46, %c0_47] : memref<1x1xf32, #tpu.memory_space<vmem>>, vector<1x1xf32>
      tpu.vector_store %arg19[%c0_46, %c0_47], %67 {strides = array<i32>} : memref<1x1xf32, #tpu.memory_space<vmem>>, vector<1x1xf32>,
      %c0_48 = arith.constant 0 : index
      %c0_49 = arith.constant 0 : index
      %c0_50 = arith.constant 0 : index
      %69 = vector.load %arg12[%c0_48, %c0_49, %c0_50] : memref<1x1x128xf32, #tpu.memory_space<vmem>>, vector<1x1x128xf32>
      %70 = vector.shape_cast %69 : vector<1x1x128xf32> to vector<1x128xf32>
      %71 = vector.shape_cast %57 : vector<1x128xf32> to vector<1x1x128xf32>
      tpu.vector_store %arg12[%c0_48, %c0_49, %c0_50], %71 {strides = array<i32>} : memref<1x1x128xf32, #tpu.memory_space<vmem>>, vector<1x1x128xf32>,
      %c1_i32_51 = arith.constant 1 : i32
      %72 = arith.cmpi eq, %arg1, %c1_i32_51 : i32
      %c1_i32_52 = arith.constant 1 : i32
      %73 = arith.cmpi eq, %arg2, %c1_i32_52 : i32
      %74 = arith.andi %72, %73 : i1
      %75 = arith.extui %74 : i1 to i32
      %c0_i32_53 = arith.constant 0 : i32
      %76 = arith.cmpi ne, %75, %c0_i32_53 : i32
      scf.if %76 {
        %c0_54 = arith.constant 0 : index
        %c0_55 = arith.constant 0 : index
        %77 = vector.load %arg18[%c0_54, %c0_55] : memref<1x1xf32, #tpu.memory_space<vmem>>, vector<1x1xf32>
        %c0_56 = arith.constant 0 : index
        %c0_57 = arith.constant 0 : index
        %78 = vector.load %arg13[%c0_56, %c0_57] : memref<2x1xf32, #tpu.memory_space<vmem>>, vector<1x1xf32>
        tpu.vector_store %arg13[%c0_56, %c0_57], %77 {strides = array<i32>} : memref<2x1xf32, #tpu.memory_space<vmem>>, vector<1x1xf32>,
        %c0_58 = arith.constant 0 : index
        %c0_59 = arith.constant 0 : index
        %79 = vector.load %arg19[%c0_58, %c0_59] : memref<1x1xf32, #tpu.memory_space<vmem>>, vector<1x1xf32>
        %c1 = arith.constant 1 : index
        %c0_60 = arith.constant 0 : index
        %80 = vector.load %arg13[%c1, %c0_60] : memref<2x1xf32, #tpu.memory_space<vmem>>, vector<1x1xf32>
        tpu.vector_store %arg13[%c1, %c0_60], %79 {strides = array<i32>} : memref<2x1xf32, #tpu.memory_space<vmem>>, vector<1x1xf32>,
      } else {
      }
    } else {
    }
    return
  }
  func.func @transform_0(%arg0: i32, %arg1: i32, %arg2: i32) -> (i32, i32, i32) {
    %c0_i32 = arith.constant 0 : i32
    %c0_i32_0 = arith.constant 0 : i32
    return %arg1, %c0_i32, %arg2 : i32, i32, i32
  }
  func.func @transform_1(%arg0: i32, %arg1: i32, %arg2: i32) -> (i32, i32, i32) {
    %c0_i32 = arith.constant 0 : i32
    %c0_i32_0 = arith.constant 0 : i32
    return %arg1, %c0_i32, %arg2 : i32, i32, i32
  }
  func.func @transform_2(%arg0: i32, %arg1: i32, %arg2: i32) -> (i32, i32) {
    %c0_i32 = arith.constant 0 : i32
    %c0_i32_0 = arith.constant 0 : i32
    %c0_i32_1 = arith.constant 0 : i32
    return %c0_i32, %c0_i32_0 : i32, i32
  }
  func.func @transform_3(%arg0: i32, %arg1: i32, %arg2: i32) -> (i32, i32) {
    %c0_i32 = arith.constant 0 : i32
    %c0_i32_0 = arith.constant 0 : i32
    %c0_i32_1 = arith.constant 0 : i32
    return %c0_i32, %c0_i32_0 : i32, i32
  }
  func.func @transform_4(%arg0: i32, %arg1: i32, %arg2: i32) -> (i32, i32) {
    %c0_i32 = arith.constant 0 : i32
    %c0_i32_0 = arith.constant 0 : i32
    %c0_i32_1 = arith.constant 0 : i32
    return %c0_i32, %c0_i32_0 : i32, i32
  }
  func.func @transform_5(%arg0: i32, %arg1: i32, %arg2: i32) -> (i32, i32) {
    %c0_i32 = arith.constant 0 : i32
    %c0_i32_0 = arith.constant 0 : i32
    %c0_i32_1 = arith.constant 0 : i32
    return %c0_i32, %c0_i32_0 : i32, i32
  }
  func.func @transform_6(%arg0: i32, %arg1: i32, %arg2: i32) -> (i32, i32) {
    %c0_i32 = arith.constant 0 : i32
    %c0_i32_0 = arith.constant 0 : i32
    %c0_i32_1 = arith.constant 0 : i32
    return %c0_i32, %c0_i32_0 : i32, i32
  }
  func.func @transform_7(%arg0: i32, %arg1: i32, %arg2: i32) -> (i32, i32) {
    %c0_i32 = arith.constant 0 : i32
    %c0_i32_0 = arith.constant 0 : i32
    %c0_i32_1 = arith.constant 0 : i32
    return %c0_i32, %c0_i32_0 : i32, i32
  }
  func.func @transform_8(%arg0: i32, %arg1: i32, %arg2: i32) -> (i32, i32) {
    %c0_i32 = arith.constant 0 : i32
    %c0_i32_0 = arith.constant 0 : i32
    %c0_i32_1 = arith.constant 0 : i32
    return %c0_i32, %c0_i32_0 : i32, i32
  }
  func.func @transform_9(%arg0: i32, %arg1: i32, %arg2: i32) -> (i32, i32, i32) {
    %c1_i32 = arith.constant 1 : i32
    %0 = arith.cmpi eq, %arg0, %c1_i32 : i32
    %1 = arith.extui %0 : i1 to i32
    %2 = arith.muli %arg1, %1 : i32
    %3 = arith.muli %arg2, %1 : i32
    %c0_i32 = arith.constant 0 : i32
    %c0_i32_0 = arith.constant 0 : i32
    return %2, %c0_i32, %3 : i32, i32, i32
  }
  func.func @transform_10(%arg0: i32, %arg1: i32, %arg2: i32) -> (i32, i32) {
    %c0_i32 = arith.constant 0 : i32
    %c0_i32_0 = arith.constant 0 : i32
    %c0_i32_1 = arith.constant 0 : i32
    return %c0_i32, %c0_i32_0 : i32, i32
  }
}

</mosaic_0001>

<bundles_post_ra>
// kernel: tpu_custom_call.1
= control target key start
LH: loop header
LB: loop body
LE: loop exit
PB: predicated region body
PF: predicated region fallthrough
CT: control target
= control target key end

     0   :  { %s1597_s0 = inlined_call_operand.vmem [shape: f32[2,4,256], index: 0, kind: input, shape index: {}]   ;;  %s1598_s1 = inlined_call_operand.vmem [shape: f32[2,4,256], index: 1, kind: input, shape index: {}]   ;;  %s1599_s2 = inlined_call_operand.vmem [shape: f32[8,4], index: 2, kind: input, shape index: {}]   ;;  %s1600_s3 = inlined_call_operand.vmem [shape: f32[8,4], index: 3, kind: input, shape index: {}]   ;;  %s1601_s4 = inlined_call_operand.vmem [shape: f32[8,1], index: 4, kind: input, shape index: {}]   ;;  %s1602_s5 = inlined_call_operand.vmem [shape: f32[8,1], index: 5, kind: input, shape index: {}]   ;;  %s1603_s6 = inlined_call_operand.vmem [shape: f32[8,1], index: 6, kind: input, shape index: {}]   ;;  %s1604_s7 = inlined_call_operand.vmem [shape: f32[8,1], index: 7, kind: input, shape index: {}]   ;;  %s1605_s8 = inlined_call_operand.vmem [shape: f32[1,8], index: 8, kind: input, shape index: {}]   ;;  %s1606_s9 = inlined_call_operand.hbm [shape: f32[2,1,256], index: 9, kind: output, shape index: {0}]   ;;  %s1607_s10 = inlined_call_operand.vmem [shape: f32[2,1], index: 10, kind: output, shape index: {1}]  }
   0x1   :  { %1618 = sst [smem:[#allocation17_spill]] %s1597_s0 }
   0x2   :  { %1619 = sst [smem:[#allocation18_spill]] %s1598_s1 }
   0x3   :  { %1620 = sst [smem:[#allocation19_spill]] %s1599_s2 }
   0x4   :  { %1621 = sst [smem:[#allocation20_spill]] %s1600_s3 }
   0x5   :  { %1622 = sst [smem:[#allocation21_spill]] %s1601_s4 }
   0x6   :  { %1623 = sst [smem:[#allocation22_spill]] %s1605_s8 }
   0x7   :  { %1624 = sst [smem:[#allocation23_spill]] %s1606_s9 }
   0x8   :  { %1625 = sst [smem:[#allocation24_spill]] %s1607_s10 }
   0x9   :  { %16 = vsyncpa [#allocation9], 0 }
   0xa   :  { %18 = vsyncpa [#allocation9 + $0x1], 0  ;;  %s1389_s13 = smov 0   ;;  %s1391_s14 = smov 0  }
   0xb   :  { %s1393_s15 = smov 0   ;;  %s1395_s16 = smov 0  }
   0xc   :  { %s1397_s17 = smov 0   ;;  %s1399_s18 = smov 0  }
   0xd   :  { %s1401_s19 = smov 0   ;;  %s1403_s20 = smov 0  }
   0xe   :  { %s1405_s21 = smov 0   ;;  %s1407_s22 = smov 0  }
   0xf LB: > { %1626 = sst [smem:[#allocation11_spill]] %s1289_s13  ;;  %s1059_s23 = sadd.s32 4294967295, %s1325_s22   ;;  %s1325_s22 = sphi %s1407_s22, %s24_s22   ;;  %s1321_s21 = sphi %s1405_s21, %s1650_s21   ;;  %s1317_s20 = sphi %s1403_s20, %s1657_s20   ;;  %s1313_s19 = sphi %s1401_s19, %s1656_s19   ;;  %s1309_s18 = sphi %s1399_s18, %s1647_s18   ;;  %s1305_s17 = sphi %s1397_s17, %s1655_s17   ;;  %s1301_s16 = sphi %s1395_s16, %s1654_s16   ;;  %s1297_s15 = sphi %s1393_s15, %s1653_s15   ;;  %s1293_s14 = sphi %s1391_s14, %s1652_s14   ;;  %s1289_s13 = sphi %s1389_s13, %s1651_s13  }
  0x10   : > { %1627 = sst [smem:[#allocation12_spill]] %s1321_s21  ;;  %s36_s24 = sadd.s32 1, %s1313_s19 }
  0x11   : > { %p37_p0 = scmp.ge.s32.totalorder %s36_s24, 2  ;;  %s39_s25 = sadd.s32 1, %s1317_s20 }
  0x12   : > { %s43_s26 = sadd.s32 1, %s1321_s21  ;;  %p250_p1 = scmp.eq.s32.totalorder %s1321_s21, 1 }
  0x13   : > { %s1659_s24 = smov (%p37_p0, %s36_s24), 0  ;;  %s1661_s25 = smov (!%p37_p0, %s39_s25), %s1317_s20 }
  0x14   : > { %1628 = sst [smem:[#allocation13_spill]] %s1659_s24  ;;  %p41_p2 = scmp.ge.s32.totalorder %s1661_s25, 2 }
  0x15   : > { %s251_s27 = scalar_select %p250_p1, 1, 0 }
  0x16   : > { %p273_p3 = scmp.ne.s32.totalorder %s1297_s15, %s1293_s14  ;;  %s1060_s28 = sadd.s32 4294967294, %s1325_s22  }
  0x17   : > { %p274_p4 = scmp.eq.s32.totalorder %s1059_s23, 7  ;;  %s1663_s25 = smov (%p41_p2, %s1661_s25), 0 }
  0x18   : > { %1629 = sst [smem:[#allocation14_spill]] %s1663_s25  ;;  %s1665_s26 = smov (!%p41_p2, %s43_s26), %s1321_s21 }
  0x19   : > { %p1453_p5 = por %p274_p4, %p273_p3  ;;  %p45_p6 = scmp.ge.s32.totalorder %s1665_s26, 2 }
  0x1a   : > { %p279_p7 = scmp.ne.s32.totalorder %s1293_s14, %s1289_s13  ;;  %p280_p8 = scmp.eq.s32.totalorder %s1060_s28, 7 }
  0x1b   : > { %s1630_s29 = scalar_select %p1453_p5, 1, 0 }
  0x1c   : > { %p1063_p9 = scmp.ge.s32.totalorder %s1325_s22, 1  ;;  %s1667_s26 = smov (%p45_p6, %s1665_s26), 0 }
  0x1d   : > { %1631 = sst [smem:[#allocation15_spill]] %s1630_s29  ;;  %p1462_p10 = por %p280_p8, %p279_p7 }
  0x1e   : > { %1632 = sst [smem:[#allocation16_spill]] %s1667_s26  ;;  %p362_p11 = scmp.lt.s32.totalorder %s1325_s22, 9 }
  0x1f   : > { %p254_p12 = scmp.eq.s32.totalorder %s1667_s26, 1  ;;  %s252_s11 = smul.u32 %s1317_s20, %s251_s27 }
  0x20   : > { %p363_p13 = pnand %p1063_p9, %p362_p11  ;;  %s253_s23 = smul.u32 %s1313_s19, %s251_s27 }
  0x21   : > { %s255_s12 = scalar_select %p254_p12, 1, 0 }
  0x22   : > { %s263_s10 = sadd.s32 1, %s1297_s15  ;;  %s1617_s26 = sand.u32 (!%p363_p13), 1, %s1293_s14  }
  0x23   : > { %s256_s21 = smul.u32 %s255_s12, %s1663_s25  ;;  %p410_p1 = scmp.lt.s32.totalorder (!%p363_p13), %s1305_s17, 1 }
  0x24   : > { %s257_s9 = smul.u32 %s255_s12, %s1659_s24  ;;  %p412_p2 = scmp.lt.s32.totalorder (!%p363_p13), %s1301_s16, 1 }
  0x25   : > { %s258_s13 = ssub.s32 %s252_s11, %s256_s21  ;;  %s1634_s0 = sld [smem:[#allocation17_spill]] (!%p363_p13) }
  0x26   : > { %s259_s29 = ssub.s32 %s253_s23, %s257_s9  ;;  %366 = sbr.rel (%p363_p13) target bundleno = 1141 (0x475), region = 56 }
  0x27   : > { %s260_s28 = sor.u32 %s259_s29, %s258_s13  ;;  %s1635_s1 = sld [smem:[#allocation18_spill]] (!%p363_p13) }
  0x28   : > { %p261_p0 = scmp.eq.s32.totalorder %s260_s28, 0  ;;  %s1493_s24 = scalar_lea.vmem (!%p363_p13), [#allocation8], %s1617_s26 }
  0x29   : > { %p1068_p3 = scmp.ne.s32.totalorder (!%p363_p13), %s1309_s18, 0 }
  0x2a   : > { %s1474_s8 = scalar_select %p261_p0, %s1297_s15, %s263_s10  }
  0x2b   : > { %s411_s27 = scalar_select %p410_p1, %s1305_s17, 1 }
  0x2c   : > { %s413_s25 = scalar_select %p412_p2, %s1301_s16, 1 }
  0x2d   : > { %s1064_s12 = sshll.u32 %s411_s27, 1  ;;  %p436_p4 = scmp.eq.s32.totalorder (!%p1068_p3), %s1305_s17, 0 }
  0x2e   : > { %s415_s21 = sadd.s32 %s1064_s12, %s413_s25  ;;  %435 = sbr.rel (%p1068_p3) target bundleno = 406 (0x196), region = 60 }
  0x2f   : > { %s1065_s9 = sshll.u32 %s415_s21, 2  ;;  %p437_p6 = scmp.eq.s32.totalorder (!%p1068_p3), %s1301_s16, 0 }
  0x30   : > { %s417_s10 = scalar_lea.vmem %s1634_s0, %s1065_s9  ;;  %s425_s28 = scalar_lea.vmem %s1635_s1, %s1065_s9 }
  0x31   : > { %v1487_v0 = vld [vmem:[%s417_s10] sm:$0xf]  ;;  %p438_p7 = pnand (!%p1068_p3), %p437_p6, %p436_p4 }
  0x32   : > { %v1489_v1 = vld [vmem:[%s425_s28] sm:$0xf] }
  0x33   : > { %441 = sbr.rel (%p438_p7) target bundleno = 60 (0x3c), region = 64 }
  0x38   : > { %vm442_vm0 = vcmask 7168   ;;  %vm447_vm1 = vcmask 0   ;;  %v1327_v2 = vmov 0.0  }
  0x39   : > { %443 = vst.msk [vmem:[#allocation2] sm:$0xff] %vm442_vm0, %v1327_v2  ;;  %444 = vst.msk [vmem:[#allocation3] sm:$0xff] %vm442_vm0, %v1327_v2 }
  0x3a   : > { %445 = vst.msk [vmem:[#allocation4] sm:$0xff] %vm442_vm0, %v1327_v2  ;;  %446 = vst.msk [vmem:[#allocation5] sm:$0xff] %vm442_vm0, %v1327_v2 }
  0x3b   : > { %448 = vst.msk [vmem:[#allocation6] sm:$0x1] %vm447_vm1, %v1327_v2  ;;  %449 = vst.msk [vmem:[#allocation7] sm:$0x1] %vm447_vm1, %v1327_v2 }
  0x3c PF: > { %vm455_vm2 = vcmask 1043456   ;;  %v1328_v3 = vmov 0.0   ;;  %s1636_s2 = sld [smem:[#allocation19_spill]]  ;;  %vm451_vm3 = vcmask 31744   ;;  %vm1329_vm4 = vmmov 0  }
  0x3d   : > { %1093 = vmatprep.subr.mxu0 %v1328_v3  ;;  %1098 = vmatprep.subr.mxu1 %v1328_v3  ;;  %s1637_s3 = sld [smem:[#allocation20_spill]]  ;;  %vm610_vm5 = vcmask 7168  }
  0x3e   : > { %1094 = vmatpush3.msk.msra.mxu0 %vm455_vm2, %v1487_v0  ;;  %1095 = vmatprep.mubr.msk.f32.mxu0 %vm1329_vm4, %v1328_v3 }
  0x3f   : > { %1099 = vmatpush3.msk.msra.mxu1 %vm455_vm2, %v1489_v1  ;;  %1100 = vmatprep.mubr.msk.f32.mxu1 %vm1329_vm4, %v1328_v3 }
  0x40   : > { %v606_v13 = vld [vmem:[#allocation2] sm:$0xff]  ;;  %v612_v19 = vld [vmem:[#allocation3] sm:$0xff] }
  0x41   : > { %v618_v12 = vld [vmem:[#allocation4] sm:$0xff]  ;;  %v623_v18 = vld [vmem:[#allocation5] sm:$0xff] }
  0x42   : > { %v450_v4 = vld [vmem:[%s1636_s2] sm:$0xff] }
  0x43   : > { %v529_v5 = vld [vmem:[%s1637_s3] sm:$0xff]  ;;  %1096 = vmatmul.mubr.msk.f32.vlgmr.msra.gmra.mxu0 %vm451_vm3, %v450_v4 }
  0x44   : > { %1101 = vmatmul.mubr.msk.f32.vlgmr.msra.gmra.mxu1 %vm451_vm3, %v529_v5 }
 0x103   : > { %v525_v6 = vpop.f32.mrf.mxu0 }
 0x104   : > { %v602_v7 = vpop.f32.mrf.mxu1  ;;  %607 = vadd.xlane.f32.xlu0 %v525_v6  ;;  %v613_v11 = vmul.f32 %v525_v6, %v525_v6 }
 0x105   : > { %619 = vadd.xlane.f32.xlu1 %v602_v7  ;;  %v1097_v8 = vpop.f32.mrf.mxu0  ;;  %v624_v10 = vmul.f32 %v602_v7, %v602_v7 }
 0x106   : > { %v1102_v9 = vpop.f32.mrf.mxu1 }
 0x108   : > { %614 = vadd.xlane.f32.xlu0 %v613_v11 }
 0x109   : > { %625 = vadd.xlane.f32.xlu1 %v624_v10 }
 0x18d   : > { %v608_v15 = vpop.xlane.xlu0 %607 }
 0x18e   : > { %v620_v14 = vpop.xlane.xlu1 %619  ;;  %v609_v17 = vadd.f32 %v608_v15, %v606_v13 }
 0x18f   : > { %v621_v16 = vadd.f32 %v620_v14, %v618_v12 }
 0x190   : > { %611 = vst.msk [vmem:[#allocation2] sm:$0xff] %vm610_vm5, %v609_v17 }
 0x191   : > { %622 = vst.msk [vmem:[#allocation4] sm:$0xff] %vm610_vm5, %v621_v16  ;;  %v615_v21 = vpop.xlane.xlu0 %614 }
 0x192   : > { %v626_v20 = vpop.xlane.xlu1 %625  ;;  %v616_v23 = vadd.f32 %v615_v21, %v612_v19 }
 0x193   : > { %v627_v22 = vadd.f32 %v626_v20, %v623_v18 }
 0x194   : > { %617 = vst.msk [vmem:[#allocation3] sm:$0xff] %vm610_vm5, %v616_v23 }
 0x195   : > { %628 = vst.msk [vmem:[#allocation5] sm:$0xff] %vm610_vm5, %v627_v22 }
 0x196 PF: > { %p1073_p8 = scmp.ne.s32.totalorder %s1309_s18, 1 }
 0x197   : > { %s1638_s4 = sld [smem:[#allocation21_spill]] (!%p1073_p8)  ;;  %p926_p9 = scmp.eq.s32.totalorder (!%p1073_p8), %s1305_s17, 1 }
 0x198   : > { %632 = sbr.rel (%p1073_p8) target bundleno = 1113 (0x459), region = 68  ;;  %s1639_s2 = sld [smem:[#allocation19_spill]] (!%p1073_p8) }
 0x199   : > { %s1640_s3 = sld [smem:[#allocation20_spill]] (!%p1073_p8)  ;;  %p927_p11 = scmp.eq.s32.totalorder (!%p1073_p8), %s1301_s16, 1 }
 0x19a   : > { %s1641_s10 = sld [smem:[#allocation22_spill]] (!%p1073_p8) }
 0x19b   : > { %p928_p12 = pnand (!%p1073_p8), %p927_p11, %p926_p9 }
 0x19d   : > { %v633_v24 = vld [vmem:[#allocation2] sm:$0xff]  ;;  %v635_v25 = vld [vmem:[#allocation3] sm:$0xff]  ;;  %v1330_v26 = vmov 0   ;;  %v643_v29 = vld [vmem:[#allocation4] sm:$0xff]  ;;  %v1331_v40 = vmov 0.0   ;;  %vm678_vm6 = vcmask 1043456  }
 0x19e   : > { %1211 = vset.pattern.permute.xlu0 %v1330_v26  ;;  %v634_v27 = vmul.f32 0.001953125, %v633_v24  ;;  %v636_v28 = vmul.f32 0.001953125, %v635_v25  ;;  %v645_v30 = vld [vmem:[#allocation5] sm:$0xff]  ;;  %1212 = vset.pattern.permute.xlu1 %v1330_v26  ;;  %v644_v31 = vmul.f32 0.001953125, %v643_v29  ;;  %v639_v39 = vld [vmem:[%s1638_s4] sm:$0xff]  ;;  %vm1332_vm7 = vmmov 0  }
 0x19f   : > { %v646_v32 = vmul.f32 0.001953125, %v645_v30  ;;  %1108 = vmatprep.subr.mxu1 %v1331_v40  ;;  %1103 = vmatprep.subr.mxu0 %v1331_v40  ;;  %v649_v42 = vld [vmem:[%s1603_s6] sm:$0xff]  ;;  %vm674_vm8 = vcmask 31744   ;;  %vm836_vm9 = vcmask 64512   ;;  %vm911_vm10 = vcmask 1040384   ;;  %s1642_s28 = sld [smem:[#allocation24_spill]] (!%p928_p12) }
 0x1a0   : > { %v637_v33 = vmul.f32 %v634_v27, %v634_v27  ;;  %v647_v34 = vmul.f32 %v644_v31, %v644_v31  ;;  %1109 = vmatpush3.msk.msra.mxu1 %vm678_vm6, %v1487_v0  ;;  %1110 = vmatprep.mubr.msk.f32.mxu1 %vm1332_vm7, %v1331_v40  ;;  %v653_v47 = vld [vmem:[%s1602_s5] sm:$0xff]  ;;  %vm916_vm11 = vcmask 0  }
 0x1a1   : > { %1104 = vmatpush3.msk.msra.mxu0 %vm678_vm6, %v1489_v1  ;;  %1105 = vmatprep.mubr.msk.f32.mxu0 %vm1332_vm7, %v1331_v40  ;;  %v656_v48 = vld [vmem:[%s1604_s7] sm:$0xff] }
 0x1a2   : > { %v638_v35 = vsub.f32 %v636_v28, %v637_v33  ;;  %v648_v36 = vsub.f32 %v646_v32, %v647_v34  ;;  %1113 = vmatprep.subr.mxu0 %v1331_v40  ;;  %v660_v53 = vld [vmem:[%s1639_s2] sm:$0xff] }
 0x1a3   : > { %v667_v56 = vld [vmem:[%s1640_s3] sm:$0xff] }
 0x1a4   : > { %v640_v37 = vadd.f32 1e-05, %v638_v35  ;;  %v650_v38 = vadd.f32 1e-05, %v648_v36  ;;  %v835_v3 = vld [vmem:[%s1641_s10] sm:$0x1] }
 0x1a5   : > { %v910_v9 = vld [vmem:[#allocation6] sm:$0x1]  ;;  %v918_v11 = vld [vmem:[#allocation7] sm:$0x1] }
 0x1a6   : > { %1213 = vrsqrt.f32 %v640_v37 }
 0x1a7   : > { %1215 = vrsqrt.f32 %v650_v38 }
 0x1b3   : > { %v1214_v41 = vpop.eup %1213 }
 0x1b4   : > { %v1216_v43 = vpop.eup %1215  ;;  %v642_v44 = vmul.f32 %v1214_v41, %v639_v39 }
 0x1b5   : > { %v652_v46 = vmul.f32 %v1216_v43, %v649_v42 }
 0x1b6   : > { %663 = vperm.xlu0 %1211, %v642_v44   ;;  %v654_v45 = vmul.f32 %v642_v44, %v634_v27 }
 0x1b7   : > { %v657_v49 = vmul.f32 %v652_v46, %v644_v31 }
 0x1b8   : > { %v655_v50 = vsub.f32 %v653_v47, %v654_v45 }
 0x1b9   : > { %v658_v51 = vsub.f32 %v656_v48, %v657_v49 }
 0x1ba   : > { %670 = vperm.xlu0 %1211, %v652_v46  }
 0x1bb   : > { %v659_v52 = vadd.f32 %v658_v51, %v655_v50 }
 0x1bd   : > { %830 = vperm.xlu1 %1212, %v659_v52  }
 0x231   : > { %v664_v54 = vpop.permute.xlu0 %663 }
 0x232   : > { %v666_v55 = vmul.f32 %v664_v54, %v660_v53 }
 0x234   : > { %1111 = vmatmul.mubr.msk.f32.vlgmr.msra.gmra.mxu1 %vm674_vm8, %v666_v55 }
 0x235   : > { %v671_v57 = vpop.permute.xlu0 %670 }
 0x236   : > { %v673_v58 = vmul.f32 %v671_v57, %v667_v56 }
 0x238   : > { %1106 = vmatmul.mubr.msk.f32.vlgmr.msra.gmra.mxu0 %vm674_vm8, %v673_v58  ;;  %v831_v62 = vpop.permute.xlu1 %830 }
 0x239   : > { %1115 = vmatprep.mubr.msk.f32.mxu0 %vm1332_vm7, %v1331_v40 }
 0x2f4   : > { %v824_v59 = vpop.f32.mrf.mxu1 }
 0x2f6   : > { %v1112_v60 = vpop.f32.mrf.mxu1 }
 0x2f8   : > { %v748_v61 = vpop.f32.mrf.mxu0 }
 0x2f9   : > { %v825_v63 = vadd.f32 %v824_v59, %v748_v61 }
 0x2fa   : > { %v1107_v0 = vpop.f32.mrf.mxu0 }
 0x2fb   : > { %v833_v1 = vadd.f32 %v831_v62, %v825_v63 }
 0x2fd   : > { %v834_v2 = vmax.f32 %v833_v1, 0.0 }
 0x2ff   : > { %1114 = vmatpush3.msra.mxu0 %v834_v2 }
 0x300   : > { %1116 = vmatmul.mubr.msk.f32.vlgmr.msra.gmra.mxu0 %vm836_vm9, %v835_v3 }
 0x3c0   : > { %v906_v4 = vpop.f32.mrf.mxu0 }
 0x3c1   : > { %925 = vst [vmem:[%s1493_s24] sm:$0x1] %v906_v4  ;;  %v912_v5 = vsel %vm911_vm10, %v906_v4, 0.0  ;;  %v919_v6 = vmul.f32 %v906_v4, %v906_v4 }
 0x3c2   : > { %v1117_v7 = vpop.f32.mrf.mxu0  ;;  %913 = vadd.xlane.f32.xlu1 %v912_v5 }
 0x3c3   : > { %v920_v8 = vsel %vm911_vm10, %v919_v6, 0.0 }
 0x3c4   : > { %921 = vadd.xlane.f32.xlu0 %v920_v8 }
 0x44b   : > { %v914_v10 = vpop.xlane.xlu1 %913 }
 0x44c   : > { %v915_v12 = vadd.f32 %v914_v10, %v910_v9  ;;  %931 = sbr.rel (%p928_p12) target bundleno = 1113 (0x459), region = 72 }
 0x44d   : > { %v922_v13 = vpop.xlane.xlu0 %921 }
 0x44e   : > { %917 = vst.msk [vmem:[#allocation6] sm:$0x1] %vm916_vm11, %v915_v12  ;;  %v923_v14 = vadd.f32 %v922_v13, %v918_v11 }
 0x450   : > { %924 = vst.msk [vmem:[#allocation7] sm:$0x1] %vm916_vm11, %v923_v14 }
 0x455   : > { %v932_v15 = vld [vmem:[#allocation6] sm:$0x1] }
 0x456   : > { %933 = vst.msk [vmem:[%s1642_s28] sm:$0x1] %vm916_vm11, %v932_v15 }
 0x457   : > { %v934_v16 = vld [vmem:[#allocation7] sm:$0x1] }
 0x458   : > { %935 = vst.msk [vmem:[%s1642_s28 + $0x1] sm:$0x1] %vm916_vm11, %v934_v16 }
 0x459 PF: > { %p943_p13 = scmp.eq.s32.totalorder %s1309_s18, 1  ;;  %s955_s13 = sshll.u32 %s1493_s24, 4  ;;  %s956_s13 = int_to_ptr.vmem [resolvable:$true] %s955_s13 }
 0x45a   : > { %s1644_s27 = sld [smem:[#allocation23_spill]]  ;;  %s1645_s1 = sand.u32 1, %s1293_s14  }
 0x45b   : > { %s944_s21 = scalar_select %p943_p13, 1, 0 }
 0x45c   : > { %s937_s2 = scalar_lea.sflag [#allocation9], %s1645_s1  ;;  %s1217_s3 = scalar_lea.vmem %s956_s13, 16 }
 0x45d   : > { %s945_s9 = smul.u32 %s1305_s17, %s944_s21  ;;  %p1218_p0 = scmp.ne.s32.totalorder %s956_s13, %s1217_s3 }
 0x45e   : > { %s946_s29 = smul.u32 %s1301_s16, %s944_s21  ;;  %s1333_s18 = smov [#allocation8]  }
 0x45f   : > { %s1079_s10 = sshll.u32 %s945_s9, 1  ;;  %p1219_p1 = pnand %p1218_p0, %p1453_p5 }
 0x460   : > { %s951_s11 = sadd.s32 %s1079_s10, %s946_s29  ;;  %s1221_s4 = sshll.u32 %s1333_s18, 4  ;;  %s1222_s4 = int_to_ptr.vmem [resolvable:$false] %s1221_s4 }
 0x461   : > { %s1080_s23 = sshll.u32 %s951_s11, 4  ;;  %p1220_p2 = pneg %p1219_p1 }
 0x462   : > { %s953_s0 = scalar_lea.hbm %s1644_s27, %s1080_s23  ;;  %s1223_s17 = scalar_lea.vmem %s1222_s4, 32 }
 0x463   : > { %p1224_p3 = scmp.lt.s32.totalorder %s956_s13, %s1222_s4  ;;  %p1225_p4 = scmp.lt.s32.totalorder %s1223_s17, %s1217_s3 }
 0x465   : > { %p1226_p6 = por %p1225_p4, %p1224_p3 }
 0x467   : > { %p1227_p7 = pnand %p1226_p6, %p1220_p2 }
 0x469   : > { %1230 = shalt.err (!%p1227_p7)
}
 0x46a   : > { %s1231_s16 = scalar_lea.hbm %s953_s0, 16  ;;  %s1235_s26 = scalar_lea.hbm %s1644_s27, 64 }
 0x46b   : > { %p1232_p8 = scmp.ne.s32.totalorder %s953_s0, %s1231_s16  ;;  %p1236_p12 = scmp.lt.s32.totalorder %s953_s0, %s1644_s27 }
 0x46c   : > { %p1237_p13 = scmp.lt.s32.totalorder %s1235_s26, %s1231_s16 }
 0x46d   : > { %p1233_p9 = pnand %p1232_p8, %p1453_p5 }
 0x46e   : > { %p1238_p0 = por %p1237_p13, %p1236_p12 }
 0x46f   : > { %p1234_p11 = pneg %p1233_p9 }
 0x471   : > { %p1239_p1 = pnand %p1238_p0, %p1234_p11 }
 0x473   : > { %1242 = shalt.err (!%p1239_p1)
}
 0x474   : > { %1118 = dma.vmem_to_hbm [thread:$0]  (%p1453_p5), %s956_s13, 16, %s953_s0, %s937_s2  }
 0x475 PF: > { %s1646_s3 = sld [smem:[#allocation11_spill]]  ;;  %p1124_p2 = scmp.ge.s32.totalorder %s1325_s22, 2 }
 0x477   : > { %p1121_p3 = pnand %p1124_p2, %p1462_p10 }
 0x479   : > { %p1122_p4 = pneg %p1121_p3 }
 0x47b   : > { %s973_s4 = sand.u32 1, %s1646_s3  }
 0x47c   : > { %s974_s29 = scalar_lea.sflag [#allocation9], %s973_s4 }
 0x47d   : > { %1284 = dma.done.wait (%p1122_p4), %s974_s29, 16  }
 0x47e   : > { %1286 = vsyncadd (%p1122_p4), %s974_s29, 4294967280  ;;  %s24_s22 = sadd.s32 1, %s1325_s22   ;;  %s1647_s18 = sld [smem:[#allocation12_spill]] }
 0x47f   : > { %p21_p6 = scmp.ge.s32.totalorder %s24_s22, 10   ;;  %s1648_s0 = sld [smem:[#allocation13_spill]] }
 0x480   : > { %s1649_s2 = sld [smem:[#allocation14_spill]]  ;;  %s1651_s13 = smov %s1293_s14 }
 0x481   : > { %s1650_s21 = sld [smem:[#allocation16_spill]]  ;;  %s1652_s14 = smov %s1297_s15 }
 0x482   : > { %s1653_s15 = smov %s1474_s8  ;;  %s1654_s16 = smov %s1313_s19 }
 0x483   : > { %s1655_s17 = smov %s1317_s20  ;;  %23 = sbr.rel (!%p21_p6) target bundleno = 15 (0xf), region = 118 }
 0x485   : > { %s1656_s19 = smov %s1648_s0 }
 0x486   : > { %s1657_s20 = smov %s1649_s2 }
 0x488   :  { %978 = vsyncpa [#allocation9], 1 }
 0x489   :  { %980 = vsyncpa [#allocation9 + $0x1], 1 }

</bundles_post_ra>
